<compile_context>
chip_gen: v7x
topology: tpu7x:2x2x1
jax: 0.10.0
libtpu: 0.0.40
codegen_flags: <defaults>
</compile_context>

<pallas_src>
import functools
import math

import jax
import jax.numpy as jnp
from jax.experimental import pallas as pl
from jax.experimental.pallas import tpu as pltpu

_TWO_PI = 2.0 * math.pi
_INV_TWO_PI = 1.0 / _TWO_PI


def _vnl_kernel(x_ref, w_ref, aff_ref, o_ref, *, TH, W, cin, cout):
    """One (batch, row-tile) grid step.

    x_ref  : (1, Cin, H+2, W+2)  zero-padded input image (whole batch element)
    w_ref  : (2*Cout, 9*Cin)     fused [magnitude; angle] im2col conv weights
    aff_ref: (2*Cout, 2)         col 0 = scale, col 1 = shift (bias + BN folded)
    o_ref  : (1, 2*Cout, TH*W)   lane-dense output slab for this row tile
    """
    h = pl.program_id(1)
    i0 = pl.multiple_of(h * TH, TH)          # first output row of this tile

    # im2col: gather the 9 shifted (Cin, TH, W) taps into one (9*Cin, TH*W) slab.
    cols = []
    for kh in range(3):
        for kw in range(3):
            patch = x_ref[0, :, pl.ds(i0 + kh, TH), pl.ds(kw, W)]   # (Cin, TH, W)
            cols.append(patch.reshape(cin, TH * W))
    patches = jnp.concatenate(cols, axis=0)                          # (9*Cin, TH*W)

    # Single fused MXU matmul: rows 0:Cout = magnitude conv, Cout:2*Cout = angle.
    acc = jnp.dot(w_ref[...], patches, preferred_element_type=jnp.float32)

    # conv bias + BatchNorm(eval) folded into a per-channel affine.
    y = acc * aff_ref[:, 0:1] + aff_ref[:, 1:2]                      # (2*Cout, TH*W)

    # Magnitude branch: ReLU.  Angle branch: identity activation + wrap to [-pi, pi]
    # via a VPU-only mul/floor/fnma (equivalent to atan2(sin(a), cos(a))).
    o_ref[0, :cout, :] = jnp.maximum(y[:cout], 0.0)
    ang = y[cout:]
    o_ref[0, cout:, :] = ang - _TWO_PI * jnp.floor(ang * _INV_TWO_PI + 0.5)


def _pick_row_tile(H, W):
    """Rows per spatial tile: need H % TH == 0 and TH*W a multiple of 128 lanes;
    otherwise fall back to one full-height tile (always legal)."""
    for th in (8, 16, 4, 32, 2, 64):
        if th <= H and H % th == 0 and (th * W) % 128 == 0:
            return th
    return H


def vector_neuron_layer(x_nchw, params, eps=1e-5):
    """Pallas implementation. Input/output are NCHW, matching PyTorch."""
    B, cin, H, W = x_nchw.shape
    cout = params["wm"].shape[0]
    TH = _pick_row_tile(H, W)

    # Spatial zero-pad by 1 (conv padding=1). NCHW throughout -- no transposes.
    xpad = jnp.pad(x_nchw.astype(jnp.float32), ((0, 0), (0, 0), (1, 1), (1, 1)))

    # PyTorch conv weight [Cout, Cin, 3, 3] -> im2col column order (kh, kw, cin);
    # magnitude and angle branches fused along the output-channel axis.
    def im2col_w(w):
        return jnp.transpose(w, (0, 2, 3, 1)).reshape(cout, 9 * cin)

    w_fused = jnp.concatenate(
        [im2col_w(params["wm"]), im2col_w(params["wa"])], axis=0
    ).astype(jnp.float32)                                    # (2*Cout, 9*Cin)
    # TODO(synk): cast xpad / w_fused to bf16 (keeping f32 accumulate) for extra MXU
    # throughput on v5e/v6e/v7x once a looser-than-1e-4 numerical tolerance is OK.

    # Fold conv bias + eval-mode BatchNorm into per-channel scale/shift:
    #   y = (conv + b - mean)/sqrt(var+eps)*gamma + beta = conv*scale + shift
    def fold(bias, gamma, beta, mean, var):
        scale = gamma / jnp.sqrt(var + eps)
        return scale, (bias - mean) * scale + beta

    ms, mh = fold(params["bm"], params["m_gamma"], params["m_beta"],
                  params["m_mean"], params["m_var"])
    asc, ash = fold(params["ba"], params["a_gamma"], params["a_beta"],
                    params["a_mean"], params["a_var"])
    affine = jnp.stack([jnp.concatenate([ms, asc]),
                        jnp.concatenate([mh, ash])], axis=1)  # (2*Cout, 2)

    kernel = functools.partial(_vnl_kernel, TH=TH, W=W, cin=cin, cout=cout)

    out_flat = pl.pallas_call(
        kernel,
        out_shape=jax.ShapeDtypeStruct((B, 2 * cout, H * W), jnp.float32),
        grid_spec=pltpu.PrefetchScalarGridSpec(
            num_scalar_prefetch=0,
            grid=(B, H // TH),
            in_specs=[
                # Whole padded image per batch element; the block index ignores the
                # row-tile axis so it is only re-DMA'd when b changes.
                pl.BlockSpec((1, cin, H + 2, W + 2), lambda b, h: (b, 0, 0, 0)),
                pl.BlockSpec((2 * cout, 9 * cin), lambda b, h: (0, 0)),
                pl.BlockSpec((2 * cout, 2), lambda b, h: (0, 0)),
            ],
            out_specs=pl.BlockSpec((1, 2 * cout, TH * W), lambda b, h: (b, 0, h)),
        ),
        compiler_params=pltpu.CompilerParams(
            dimension_semantics=("parallel", "parallel"),
            # Tiny footprint at these shapes; at large H/W shrink TH (and/or tile
            # Cin) so double-buffered in+out blocks stay under v7x's 64 MiB VMEM.
            vmem_limit_bytes=32 * 1024 * 1024,
        ),
    )(xpad, w_fused, affine)

    # Free reshape (split of the contiguous trailing dim) back to NCHW spatial dims.
    # Channels 0:Cout = magnitudes, Cout:2*Cout = angles.
    return out_flat.reshape(B, 2 * cout, H, W)


def init_params(key, cin, cout, ksize=3):
    """Deterministic param init mirroring the module's _initialize_weights()."""
    k1, k2 = jax.random.split(key)
    fan_in = cin * ksize * ksize
    fan_out = cout * ksize * ksize
    bound = (6.0 / (fan_in + fan_out)) ** 0.5              # xavier_uniform_
    wm = jax.random.uniform(k1, (cout, cin, ksize, ksize), jnp.float32,
                            -bound, bound)
    wa = jax.random.uniform(k2, (cout, cin, ksize, ksize), jnp.float32,
                            -math.pi, math.pi)             # uniform(-pi, pi)
    zeros = jnp.zeros((cout,), jnp.float32)
    ones = jnp.ones((cout,), jnp.float32)
    return dict(
        wm=wm, bm=zeros,                                   # magnitude conv (bias=0)
        wa=wa, ba=zeros,                                   # angle conv (bias=0)
        m_gamma=ones, m_beta=zeros, m_mean=zeros, m_var=ones,   # magnitude BN
        a_gamma=ones, a_beta=zeros, a_mean=zeros, a_var=ones,   # angle BN
    )


def reference(x_nchw, params, eps=1e-5):
    """Pure-JAX reference (same eval-mode BN semantics) for verification."""
    def conv(x, w, b):
        y = jax.lax.conv_general_dilated(
            x, w, window_strides=(1, 1), padding=((1, 1), (1, 1)),
            dimension_numbers=("NCHW", "OIHW", "NCHW"),
            precision=jax.lax.Precision.HIGHEST)
        return y + b.reshape(1, -1, 1, 1)

    def bn(y, gamma, beta, mean, var):
        r = lambda v: v.reshape(1, -1, 1, 1)
        return (y - r(mean)) / jnp.sqrt(r(var) + eps) * r(gamma) + r(beta)

    mag = conv(x_nchw, params["wm"], params["bm"])
    mag = bn(mag, params["m_gamma"], params["m_beta"],
             params["m_mean"], params["m_var"])
    mag = jnp.maximum(mag, 0.0)
    ang = conv(x_nchw, params["wa"], params["ba"])
    ang = bn(ang, params["a_gamma"], params["a_beta"],
             params["a_mean"], params["a_var"])
    ang = jnp.arctan2(jnp.sin(ang), jnp.cos(ang))
    return jnp.concatenate([mag, ang], axis=1)


if __name__ == "__main__":
    B, CIN, COUT, H, W = 2, 4, 4, 16, 16
    key = jax.random.PRNGKey(0)
    kx, kp = jax.random.split(key)

    x = jax.random.normal(kx, (B, CIN, H, W), dtype=jnp.float32)
    params = init_params(kp, CIN, COUT)

    out = jax.block_until_ready(vector_neuron_layer(x, params))
    assert out.shape == (B, 2 * COUT, H, W), out.shape

    ref = jax.block_until_ready(reference(x, params))

    # Magnitude channels: direct comparison.
    mag_err = jnp.max(jnp.abs(out[:, :COUT] - ref[:, :COUT]))
    assert jnp.allclose(out[:, :COUT], ref[:, :COUT], rtol=1e-4, atol=1e-4), float(mag_err)

    # Angle channels are circular quantities: the kernel wraps with a round-based
    # formula while the reference uses atan2(sin, cos), so compare modulo 2*pi.
    d = jnp.abs(out[:, COUT:] - ref[:, COUT:])
    circ = jnp.minimum(d, 2.0 * jnp.pi - d)
    assert bool(jnp.all(circ < 5e-4)), float(jnp.max(circ))

    print("KERNEL_OK")
</pallas_src>

<mosaic_0001>
module attributes {stable_mosaic.version = 11 : i64} {
  func.func @_vnl_kernel(%arg0: i32, %arg1: i32, %arg2: memref<1x4x18x18xf32, #tpu.memory_space<vmem>>, %arg3: memref<8x36xf32, #tpu.memory_space<vmem>>, %arg4: memref<8x2xf32, #tpu.memory_space<vmem>>, %arg5: memref<1x8x128xf32, #tpu.memory_space<vmem>>) attributes {dimension_semantics = [#tpu.dimension_semantics<parallel>, #tpu.dimension_semantics<parallel>], iteration_bounds = array<i64: 2, 2>, scalar_prefetch = 0 : i64, scratch_operands = 0 : i64, tpu.core_type = #tpu.core_type<tc>, window_params = [{transform_indices = @transform_0, window_bounds = array<i64: 1, 4, 18, 18>}, {pipeline_mode = #tpu.pipeline_mode<synchronous>, transform_indices = @transform_1, window_bounds = array<i64: 8, 36>}, {pipeline_mode = #tpu.pipeline_mode<synchronous>, transform_indices = @transform_2, window_bounds = array<i64: 8, 2>}, {transform_indices = @transform_3, window_bounds = array<i64: 1, 8, 128>}]} {
    %c8_i32 = arith.constant 8 : i32
    %0 = arith.muli %arg1, %c8_i32 : i32
    %1 = tpu.assume_multiple %0, 8 : i32
    %c0_i32 = arith.constant 0 : i32
    %2 = arith.addi %1, %c0_i32 : i32
    %c0 = arith.constant 0 : index
    %c0_0 = arith.constant 0 : index
    %3 = arith.index_cast %2 : i32 to index
    %c0_1 = arith.constant 0 : index
    %4 = vector.load %arg2[%c0, %c0_0, %3, %c0_1] : memref<1x4x18x18xf32, #tpu.memory_space<vmem>>, vector<1x4x8x16xf32>
    %5 = vector.shape_cast %4 : vector<1x4x8x16xf32> to vector<4x8x16xf32>
    %6 = vector.shape_cast %5 : vector<4x8x16xf32> to vector<4x128xf32>
    %c0_i32_2 = arith.constant 0 : i32
    %7 = arith.addi %1, %c0_i32_2 : i32
    %c0_3 = arith.constant 0 : index
    %c0_4 = arith.constant 0 : index
    %8 = arith.index_cast %7 : i32 to index
    %c1 = arith.constant 1 : index
    %9 = vector.load %arg2[%c0_3, %c0_4, %8, %c1] : memref<1x4x18x18xf32, #tpu.memory_space<vmem>>, vector<1x4x8x16xf32>
    %10 = vector.shape_cast %9 : vector<1x4x8x16xf32> to vector<4x8x16xf32>
    %11 = vector.shape_cast %10 : vector<4x8x16xf32> to vector<4x128xf32>
    %c0_i32_5 = arith.constant 0 : i32
    %12 = arith.addi %1, %c0_i32_5 : i32
    %c0_6 = arith.constant 0 : index
    %c0_7 = arith.constant 0 : index
    %13 = arith.index_cast %12 : i32 to index
    %c2 = arith.constant 2 : index
    %14 = vector.load %arg2[%c0_6, %c0_7, %13, %c2] : memref<1x4x18x18xf32, #tpu.memory_space<vmem>>, vector<1x4x8x16xf32>
    %15 = vector.shape_cast %14 : vector<1x4x8x16xf32> to vector<4x8x16xf32>
    %16 = vector.shape_cast %15 : vector<4x8x16xf32> to vector<4x128xf32>
    %c1_i32 = arith.constant 1 : i32
    %17 = arith.addi %1, %c1_i32 : i32
    %c0_8 = arith.constant 0 : index
    %c0_9 = arith.constant 0 : index
    %18 = arith.index_cast %17 : i32 to index
    %c0_10 = arith.constant 0 : index
    %19 = vector.load %arg2[%c0_8, %c0_9, %18, %c0_10] : memref<1x4x18x18xf32, #tpu.memory_space<vmem>>, vector<1x4x8x16xf32>
    %20 = vector.shape_cast %19 : vector<1x4x8x16xf32> to vector<4x8x16xf32>
    %21 = vector.shape_cast %20 : vector<4x8x16xf32> to vector<4x128xf32>
    %c1_i32_11 = arith.constant 1 : i32
    %22 = arith.addi %1, %c1_i32_11 : i32
    %c0_12 = arith.constant 0 : index
    %c0_13 = arith.constant 0 : index
    %23 = arith.index_cast %22 : i32 to index
    %c1_14 = arith.constant 1 : index
    %24 = vector.load %arg2[%c0_12, %c0_13, %23, %c1_14] : memref<1x4x18x18xf32, #tpu.memory_space<vmem>>, vector<1x4x8x16xf32>
    %25 = vector.shape_cast %24 : vector<1x4x8x16xf32> to vector<4x8x16xf32>
    %26 = vector.shape_cast %25 : vector<4x8x16xf32> to vector<4x128xf32>
    %c1_i32_15 = arith.constant 1 : i32
    %27 = arith.addi %1, %c1_i32_15 : i32
    %c0_16 = arith.constant 0 : index
    %c0_17 = arith.constant 0 : index
    %28 = arith.index_cast %27 : i32 to index
    %c2_18 = arith.constant 2 : index
    %29 = vector.load %arg2[%c0_16, %c0_17, %28, %c2_18] : memref<1x4x18x18xf32, #tpu.memory_space<vmem>>, vector<1x4x8x16xf32>
    %30 = vector.shape_cast %29 : vector<1x4x8x16xf32> to vector<4x8x16xf32>
    %31 = vector.shape_cast %30 : vector<4x8x16xf32> to vector<4x128xf32>
    %c2_i32 = arith.constant 2 : i32
    %32 = arith.addi %1, %c2_i32 : i32
    %c0_19 = arith.constant 0 : index
    %c0_20 = arith.constant 0 : index
    %33 = arith.index_cast %32 : i32 to index
    %c0_21 = arith.constant 0 : index
    %34 = vector.load %arg2[%c0_19, %c0_20, %33, %c0_21] : memref<1x4x18x18xf32, #tpu.memory_space<vmem>>, vector<1x4x8x16xf32>
    %35 = vector.shape_cast %34 : vector<1x4x8x16xf32> to vector<4x8x16xf32>
    %36 = vector.shape_cast %35 : vector<4x8x16xf32> to vector<4x128xf32>
    %c2_i32_22 = arith.constant 2 : i32
    %37 = arith.addi %1, %c2_i32_22 : i32
    %c0_23 = arith.constant 0 : index
    %c0_24 = arith.constant 0 : index
    %38 = arith.index_cast %37 : i32 to index
    %c1_25 = arith.constant 1 : index
    %39 = vector.load %arg2[%c0_23, %c0_24, %38, %c1_25] : memref<1x4x18x18xf32, #tpu.memory_space<vmem>>, vector<1x4x8x16xf32>
    %40 = vector.shape_cast %39 : vector<1x4x8x16xf32> to vector<4x8x16xf32>
    %41 = vector.shape_cast %40 : vector<4x8x16xf32> to vector<4x128xf32>
    %c2_i32_26 = arith.constant 2 : i32
    %42 = arith.addi %1, %c2_i32_26 : i32
    %c0_27 = arith.constant 0 : index
    %c0_28 = arith.constant 0 : index
    %43 = arith.index_cast %42 : i32 to index
    %c2_29 = arith.constant 2 : index
    %44 = vector.load %arg2[%c0_27, %c0_28, %43, %c2_29] : memref<1x4x18x18xf32, #tpu.memory_space<vmem>>, vector<1x4x8x16xf32>
    %45 = vector.shape_cast %44 : vector<1x4x8x16xf32> to vector<4x8x16xf32>
    %46 = vector.shape_cast %45 : vector<4x8x16xf32> to vector<4x128xf32>
    %47 = tpu.concatenate %6, %11, %16, %21, %26, %31, %36, %41, %46 in 0 : vector<4x128xf32>, vector<4x128xf32>, vector<4x128xf32>, vector<4x128xf32>, vector<4x128xf32>, vector<4x128xf32>, vector<4x128xf32>, vector<4x128xf32>, vector<4x128xf32> -> vector<36x128xf32>
    %c0_30 = arith.constant 0 : index
    %c0_31 = arith.constant 0 : index
    %48 = vector.load %arg3[%c0_30, %c0_31] : memref<8x36xf32, #tpu.memory_space<vmem>>, vector<8x36xf32>
    %cst = arith.constant dense<0.000000e+00> : vector<8x128xf32>
    %49 = tpu.matmul %48, %47, %cst {dimension_numbers = #tpu.dot_dimension_numbers<[1], [0], [0], [1], [0, 0, 1, 1], [], []>} : vector<8x36xf32>, vector<36x128xf32>, vector<8x128xf32> -> vector<8x128xf32>
    %c0_32 = arith.constant 0 : index
    %c0_33 = arith.constant 0 : index
    %50 = vector.load %arg4[%c0_32, %c0_33] : memref<8x2xf32, #tpu.memory_space<vmem>>, vector<8x1xf32>
    %51 = vector.broadcast %50 : vector<8x1xf32> to vector<8x128xf32>
    %52 = arith.mulf %49, %51 : vector<8x128xf32>
    %c0_34 = arith.constant 0 : index
    %c1_35 = arith.constant 1 : index
    %53 = vector.load %arg4[%c0_34, %c1_35] : memref<8x2xf32, #tpu.memory_space<vmem>>, vector<8x1xf32>
    %54 = vector.broadcast %53 : vector<8x1xf32> to vector<8x128xf32>
    %55 = arith.addf %52, %54 : vector<8x128xf32>
    %56 = vector.extract_strided_slice %55 {offsets = [0, 0], sizes = [4, 128], strides = [1, 1]} : vector<8x128xf32> to vector<4x128xf32>
    %cst_36 = arith.constant 0.000000e+00 : f32
    %57 = vector.broadcast %cst_36 : f32 to vector<4x128xf32>
    %58 = arith.maximumf %56, %57 : vector<4x128xf32>
    %c0_37 = arith.constant 0 : index
    %c0_38 = arith.constant 0 : index
    %c0_39 = arith.constant 0 : index
    %59 = vector.load %arg5[%c0_37, %c0_38, %c0_39] : memref<1x8x128xf32, #tpu.memory_space<vmem>>, vector<1x4x128xf32>
    %60 = vector.shape_cast %59 : vector<1x4x128xf32> to vector<4x128xf32>
    %61 = vector.shape_cast %58 : vector<4x128xf32> to vector<1x4x128xf32>
    tpu.vector_store %arg5[%c0_37, %c0_38, %c0_39], %61 {strides = array<i32>} : memref<1x8x128xf32, #tpu.memory_space<vmem>>, vector<1x4x128xf32>,
    %62 = vector.extract_strided_slice %55 {offsets = [4, 0], sizes = [4, 128], strides = [1, 1]} : vector<8x128xf32> to vector<4x128xf32>
    %cst_40 = arith.constant 0.159154937 : f32
    %63 = vector.broadcast %cst_40 : f32 to vector<4x128xf32>
    %64 = arith.mulf %62, %63 : vector<4x128xf32>
    %cst_41 = arith.constant 5.000000e-01 : f32
    %65 = vector.broadcast %cst_41 : f32 to vector<4x128xf32>
    %66 = arith.addf %64, %65 : vector<4x128xf32>
    %67 = math.floor %66 : vector<4x128xf32>
    %cst_42 = arith.constant 6.28318548 : f32
    %68 = vector.broadcast %cst_42 : f32 to vector<4x128xf32>
    %69 = arith.mulf %68, %67 : vector<4x128xf32>
    %70 = arith.subf %62, %69 : vector<4x128xf32>
    %c0_43 = arith.constant 0 : index
    %c4 = arith.constant 4 : index
    %c0_44 = arith.constant 0 : index
    %71 = vector.load %arg5[%c0_43, %c4, %c0_44] : memref<1x8x128xf32, #tpu.memory_space<vmem>>, vector<1x4x128xf32>
    %72 = vector.shape_cast %71 : vector<1x4x128xf32> to vector<4x128xf32>
    %73 = vector.shape_cast %70 : vector<4x128xf32> to vector<1x4x128xf32>
    tpu.vector_store %arg5[%c0_43, %c4, %c0_44], %73 {strides = array<i32>} : memref<1x8x128xf32, #tpu.memory_space<vmem>>, vector<1x4x128xf32>,
    return
  }
  func.func @transform_0(%arg0: i32, %arg1: i32) -> (i32, i32, i32, i32) {
    %c0_i32 = arith.constant 0 : i32
    %c0_i32_0 = arith.constant 0 : i32
    %c0_i32_1 = arith.constant 0 : i32
    %c0_i32_2 = arith.constant 0 : i32
    return %arg0, %c0_i32, %c0_i32_0, %c0_i32_1 : i32, i32, i32, i32
  }
  func.func @transform_1(%arg0: i32, %arg1: i32) -> (i32, i32) {
    %c0_i32 = arith.constant 0 : i32
    %c0_i32_0 = arith.constant 0 : i32
    %c0_i32_1 = arith.constant 0 : i32
    return %c0_i32, %c0_i32_0 : i32, i32
  }
  func.func @transform_2(%arg0: i32, %arg1: i32) -> (i32, i32) {
    %c0_i32 = arith.constant 0 : i32
    %c0_i32_0 = arith.constant 0 : i32
    %c0_i32_1 = arith.constant 0 : i32
    return %c0_i32, %c0_i32_0 : i32, i32
  }
  func.func @transform_3(%arg0: i32, %arg1: i32) -> (i32, i32, i32) {
    %c0_i32 = arith.constant 0 : i32
    %c0_i32_0 = arith.constant 0 : i32
    return %arg0, %c0_i32, %arg1 : i32, i32, i32
  }
}

</mosaic_0001>

<bundles_post_ra>
// kernel: tpu_custom_call.1
= control target key start
LH: loop header
LB: loop body
LE: loop exit
PB: predicated region body
PF: predicated region fallthrough
CT: control target
= control target key end

     0   :  { %8 = vsyncpa [#allocation3], 0  ;;  %s2590_s0 = inlined_call_operand.vmem [shape: f32[2,4,18,18], index: 0, kind: input, shape index: {}]   ;;  %s2591_s1 = inlined_call_operand.vmem [shape: f32[8,36], index: 1, kind: input, shape index: {}]   ;;  %s2592_s2 = inlined_call_operand.vmem [shape: f32[8,2], index: 2, kind: input, shape index: {}]   ;;  %s2593_s3 = inlined_call_operand.hbm [shape: f32[2,8,256], index: 3, kind: output, shape index: {}]  }
   0x1   :  { %10 = vsyncpa [#allocation3 + $0x1], 0  ;;  %s1855_s12 = smov 0   ;;  %s1857_s13 = smov 0  }
   0x2   :  { %s1859_s14 = smov 0   ;;  %s1861_s15 = smov 0  }
   0x3   :  { %s1863_s16 = smov 0   ;;  %s1865_s17 = smov 0  }
   0x4   :  { %s1867_s18 = smov 0   ;;  %s1869_s19 = smov 0  }
   0x5 LB: > { %s1430_s20 = sadd.s32 4294967295, %s1816_s19   ;;  %s1431_s21 = sadd.s32 4294967294, %s1816_s19   ;;  %s1816_s19 = sphi %s1869_s19, %s16_s19   ;;  %s1812_s18 = sphi %s1867_s18, %s2602_s18   ;;  %s1808_s17 = sphi %s1865_s17, %s2601_s17   ;;  %s1804_s16 = sphi %s1863_s16, %s2600_s16   ;;  %s1800_s15 = sphi %s1861_s15, %s2599_s15   ;;  %s1796_s14 = sphi %s1859_s14, %s2598_s14   ;;  %s1792_s13 = sphi %s1857_s13, %s2597_s13   ;;  %s1788_s12 = sphi %s1855_s12, %s2596_s12  }
   0x6   : > { %s25_s22 = sadd.s32 1, %s1808_s17  ;;  %s28_s23 = sadd.s32 1, %s1812_s18 }
   0x7   : > { %p26_p0 = scmp.ge.s32.totalorder %s25_s22, 2  ;;  %p115_p1 = scmp.ne.s32.totalorder %s1796_s14, %s1792_s13 }
   0x8   : > { %p116_p2 = scmp.eq.s32.totalorder %s1430_s20, 3  ;;  %p121_p5 = scmp.ne.s32.totalorder %s1792_s13, %s1788_s12 }
   0x9   : > { %s2604_s22 = smov (%p26_p0, %s25_s22), 0  ;;  %s2606_s23 = smov (!%p26_p0, %s28_s23), %s1812_s18 }
   0xa   : > { %s101_s24 = ssub.s32 %s1808_s17, %s2604_s22  ;;  %p1906_p3 = por %p116_p2, %p115_p1 }
   0xb   : > { %p30_p4 = scmp.ge.s32.totalorder %s2606_s23, 2  ;;  %p122_p6 = scmp.eq.s32.totalorder %s1431_s21, 3 }
   0xc   : > { %p1434_p7 = scmp.ge.s32.totalorder %s1816_s19, 1  ;;  %p154_p9 = scmp.lt.s32.totalorder %s1816_s19, 5 }
   0xd   : > { %s2608_s23 = smov (%p30_p4, %s2606_s23), 0  ;;  %p1915_p8 = por %p122_p6, %p121_p5 }
   0xe   : > { %s100_s27 = ssub.s32 %s1812_s18, %s2608_s23  ;;  %s105_s28 = sadd.s32 1, %s1796_s14 }
   0xf   : > { %s102_s29 = sor.u32 %s101_s24, %s100_s27  ;;  %p155_p10 = pnand %p1434_p7, %p154_p9 }
  0x10   : > { %p103_p11 = scmp.eq.s32.totalorder %s102_s29, 0  ;;  %p178_p12 = scmp.lt.s32.totalorder (!%p155_p10), %s1804_s16, 1  ;;  %v1818_v0 = vmov (!%p155_p10), 1983009808   ;;  %v194_v2 = vlaneseq (!%p155_p10)  ;;  %v1821_v54 = vmov (!%p155_p10), 1934713408  }
  0x11   : > { %158 = sbr.rel (%p155_p10) target bundleno = 601 (0x259), region = 32  ;;  %v192_v1 = vunpack.c.l.s4 (!%p155_p10), %v1818_v0  ;;  %s1437_s6 = sshll.u32 (!%p155_p10), %s1800_s15, 3  ;;  %v224_v55 = vunpack.c.l.s4 (!%p155_p10), %v1821_v54  ;;  %vm1831_vm0 = vmmov (!%p155_p10), 0   ;;  %vm285_vm1 = vcmask (!%p155_p10), 130048  }
  0x12   : > { %s1924_s30 = scalar_select %p103_p11, %s1796_s14, %s105_s28  }
  0x13   : > { %v193_v3 = vunpack.c.0.s8 (!%p155_p10), %v192_v1  ;;  %v1929_v4 = vshrl.u32 (!%p155_p10), %v194_v2, 7  ;;  %s1819_s11 = smov (!%p155_p10), 127   ;;  %s1820_s20 = smov (!%p155_p10), 126   ;;  %v225_v58 = vunpack.c.0.s8 (!%p155_p10), %v224_v55  ;;  %vm287_vm2 = vcmask (!%p155_p10), 261120  }
  0x14   : > { %s1822_s21 = smov (!%p155_p10), 32   ;;  %s1823_s24 = smov (!%p155_p10), 64   ;;  %vm289_vm3 = vcmask (!%p155_p10), 392192   ;;  %vm291_vm4 = vcmask (!%p155_p10), 523264   ;;  %vm293_vm5 = vcmask (!%p155_p10), 654336   ;;  %vm295_vm6 = vcmask (!%p155_p10), 785408  }
  0x15   : > { %v1940_v7 = vsub.s32 (!%p155_p10), %v193_v3, %v1929_v4  ;;  %v2036_v1 = vsub.s32 (!%p155_p10), %v225_v58, %v1929_v4  ;;  %s1824_s27 = smov (!%p155_p10), 96   ;;  %s1826_s28 = smov (!%p155_p10), 16   ;;  %vm297_vm7 = vcmask (!%p155_p10), 916480   ;;  %vm1231_vm8 = vcmask (!%p155_p10), 1043456  }
  0x16   : > { %s1827_s29 = smov (!%p155_p10), 48   ;;  %vm1237_vm9 = vcmask (!%p155_p10), 293888  }
  0x18   : > { %s179_s4 = scalar_select %p178_p12, %s1804_s16, 1 }
  0x1a   : > { %s1480_s5 = smul.u32 96, %s179_s4  ;;  %s1828_s4 = smov 80  }
  0x1c   : > { %s182_s9 = scalar_lea.vmem %s2590_s0, %s1480_s5  ;;  %s1829_s5 = smov 112  }
  0x1d   : > { %s1934_s10 = scalar_lea.vmem %s182_s9, %s1437_s6 }
  0x1e   : > { %v187_v5 = vld [vmem:[%s1934_s10 + $0x30] sm:$0xff]  ;;  %v185_v6 = vld [vmem:[%s1934_s10] sm:$0xff]  ;;  %v188_v10 = vld [vmem:[%s1934_s10 + $0x48] sm:$0xff] }
  0x1f   : > { %307 = vrot.lane.b32.xlu1 %v187_v5, %s1819_s11  ;;  %303 = vrot.lane.b32.xlu0 %v185_v6, %s1819_s11  ;;  %v189_v8 = vcombine.low %v185_v6, %v187_v5  ;;  %v190_v9 = vcombine.high %v185_v6, %v187_v5  ;;  %v186_v11 = vld [vmem:[%s1934_s10 + $0x18] sm:$0xff]  ;;  %v1442_v15 = vld [vmem:[%s1934_s10 + $0x49] sm:$0xff] }
  0x20   : > { %v205_v12 = vcombine.low %v186_v11, %v188_v10  ;;  %v206_v13 = vcombine.high %v186_v11, %v188_v10  ;;  %v1440_v14 = vld [vmem:[%s1934_s10 + $0x19] sm:$0xff]  ;;  %v1439_v18 = vld [vmem:[%s1934_s10 + $0x1] sm:$0xff]  ;;  %v1441_v21 = vld [vmem:[%s1934_s10 + $0x31] sm:$0xff] }
  0x21   : > { %v1948_v16 = vrot.slane %v189_v8, %v1940_v7  ;;  %v1951_v17 = vrot.slane %v190_v9, %v1940_v7  ;;  %v555_v19 = vcombine.low %v1440_v14, %v1442_v15  ;;  %v556_v20 = vcombine.high %v1440_v14, %v1442_v15  ;;  %v1445_v26 = vld [vmem:[%s1934_s10 + $0x1a] sm:$0xff]  ;;  %v1447_v27 = vld [vmem:[%s1934_s10 + $0x4a] sm:$0xff]  ;;  %v1444_v30 = vld [vmem:[%s1934_s10 + $0x2] sm:$0xff] }
  0x22   : > { %v1956_v22 = vrot.slane %v205_v12, %v1940_v7  ;;  %v1959_v23 = vrot.slane %v206_v13, %v1940_v7  ;;  %v539_v24 = vcombine.low %v1439_v18, %v1441_v21  ;;  %v540_v25 = vcombine.high %v1439_v18, %v1441_v21  ;;  %v1446_v32 = vld [vmem:[%s1934_s10 + $0x32] sm:$0xff]  ;;  %s175_s10 = sand.u32 1, %s1792_s13  }
  0x23   : > { %309 = vrot.lane.b32.xlu1 %v188_v10, %s1819_s11  ;;  %305 = vrot.lane.b32.xlu0 %v186_v11, %s1819_s11  ;;  %v1966_v28 = vrot.slane %v555_v19, %v1940_v7  ;;  %v1969_v29 = vrot.slane %v556_v20, %v1940_v7  ;;  %v898_v31 = vcombine.low %v1445_v26, %v1447_v27 }
  0x24   : > { %v1974_v33 = vrot.slane %v539_v24, %v1940_v7  ;;  %v1977_v34 = vrot.slane %v540_v25, %v1940_v7  ;;  %v899_v35 = vcombine.high %v1445_v26, %v1447_v27  ;;  %v882_v36 = vcombine.low %v1444_v30, %v1446_v32 }
  0x25   : > { %v883_v37 = vcombine.high %v1444_v30, %v1446_v32  ;;  %v237_v38 = vcombine.low %v1951_v17, %v1959_v23  ;;  %v222_v39 = vcombine.high %v1948_v16, %v1956_v22  ;;  %v238_v43 = vcombine.high %v1951_v17, %v1959_v23 }
  0x26   : > { %v572_v40 = vcombine.high %v1974_v33, %v1966_v28  ;;  %v587_v41 = vcombine.low %v1977_v34, %v1969_v29  ;;  %v588_v42 = vcombine.high %v1977_v34, %v1969_v29  ;;  %v571_v44 = vcombine.low %v1974_v33, %v1966_v28 }
  0x27   : > { %420 = vrot.lane.b32.xlu1 %v186_v11, %s1820_s20  ;;  %418 = vrot.lane.b32.xlu0 %v185_v6, %s1820_s20  ;;  %v221_v45 = vcombine.low %v1948_v16, %v1956_v22  ;;  %v2004_v46 = vrot.slane %v898_v31, %v1940_v7  ;;  %v2009_v47 = vrot.slane %v899_v35, %v1940_v7 }
  0x28   : > { %v2012_v48 = vrot.slane %v882_v36, %v1940_v7  ;;  %v2015_v49 = vrot.slane %v883_v37, %v1940_v7  ;;  %v2049_v12 = vrot.slane %v572_v40, %v2036_v1  ;;  %v2063_v25 = vrot.slane %v587_v41, %v2036_v1 }
  0x29   : > { %v2082_v54 = vrot.slane %v237_v38, %v2036_v1  ;;  %v2088_v55 = vrot.slane %v222_v39, %v2036_v1  ;;  %v2101_v38 = vrot.slane %v588_v42, %v2036_v1 }
  0x2a   : > { %v915_v50 = vcombine.high %v2012_v48, %v2004_v46  ;;  %v930_v51 = vcombine.low %v2015_v49, %v2009_v47  ;;  %v931_v52 = vcombine.high %v2015_v49, %v2009_v47  ;;  %v914_v53 = vcombine.low %v2012_v48, %v2004_v46 }
  0x2b   : > { %424 = vrot.lane.b32.xlu1 %v188_v10, %s1820_s20  ;;  %422 = vrot.lane.b32.xlu0 %v187_v5, %s1820_s20 }
  0x2f   : > { %763 = vrot.lane.b32.xlu1 %v1440_v14, %s1820_s20  ;;  %761 = vrot.lane.b32.xlu0 %v1439_v18, %s1820_s20 }
  0x33   : > { %767 = vrot.lane.b32.xlu1 %v1442_v15, %s1820_s20  ;;  %765 = vrot.lane.b32.xlu0 %v1441_v21, %s1820_s20 }
  0x37   : > { %991 = vrot.lane.b32.xlu1 %v1445_v26, %s1819_s11  ;;  %989 = vrot.lane.b32.xlu0 %v1444_v30, %s1819_s11 }
  0x3b   : > { %995 = vrot.lane.b32.xlu1 %v1447_v27, %s1819_s11  ;;  %993 = vrot.lane.b32.xlu0 %v1446_v32, %s1819_s11 }
  0x3f   : > { %648 = vrot.lane.b32.xlu1 %v1440_v14, %s1819_s11  ;;  %646 = vrot.lane.b32.xlu0 %v1439_v18, %s1819_s11 }
  0x43   : > { %652 = vrot.lane.b32.xlu1 %v1442_v15, %s1819_s11  ;;  %650 = vrot.lane.b32.xlu0 %v1441_v21, %s1819_s11  ;;  %s1435_s11 = sshll.u32 %s175_s10, 3 }
  0x47   : > { %1106 = vrot.lane.b32.xlu1 %v1445_v26, %s1820_s20  ;;  %1104 = vrot.lane.b32.xlu0 %v1444_v30, %s1820_s20 }
  0x4b   : > { %1110 = vrot.lane.b32.xlu1 %v1447_v27, %s1820_s20  ;;  %1108 = vrot.lane.b32.xlu0 %v1446_v32, %s1820_s20  ;;  %s1451_s20 = sshll.u32 %s1804_s16, 1  ;;  %s1335_s16 = scalar_lea.sflag [#allocation3], %s175_s10 }
  0x91   : > { %v308_v56 = vpop.permute.xlu1 %307  ;;  %v304_v57 = vpop.permute.xlu0 %303 }
  0x92   : > { %v315_v59 = vcombine.low %v304_v57, %v308_v56  ;;  %v316_v60 = vcombine.high %v304_v57, %v308_v56 }
  0x94   : > { %v2039_v2 = vrot.slane %v315_v59, %v1940_v7  ;;  %v330_v6 = vrot.slane %v316_v60, %v1940_v7 }
  0x95   : > { %v310_v61 = vpop.permute.xlu1 %309  ;;  %v306_v62 = vpop.permute.xlu0 %305 }
  0x96   : > { %v331_v63 = vcombine.low %v306_v62, %v310_v61  ;;  %v332_v0 = vcombine.high %v306_v62, %v310_v61 }
  0x98   : > { %v2042_v3 = vrot.slane %v331_v63, %v1940_v7  ;;  %v346_v5 = vrot.slane %v332_v0, %v1940_v7 }
  0x99   : > { %v421_v8 = vpop.permute.xlu1 %420  ;;  %v419_v9 = vpop.permute.xlu0 %418 }
  0x9a   : > { %v348_v10 = vcombine.high %v2039_v2, %v2042_v3  ;;  %v363_v11 = vcombine.low %v330_v6, %v346_v5  ;;  %v364_v40 = vcombine.high %v330_v6, %v346_v5 }
  0x9c   : > { %v2052_v4 = vrot.slane %v348_v10, %v2036_v1  ;;  %v2057_v24 = vrot.slane %v363_v11, %v2036_v1  ;;  %v2108_v62 = vrot.slane %v364_v40, %v2036_v1 }
  0x9d   : > { %v425_v13 = vpop.permute.xlu1 %424  ;;  %v423_v14 = vpop.permute.xlu0 %422 }
  0x9e   : > { %v446_v15 = vcombine.low %v421_v8, %v425_v13  ;;  %v447_v18 = vcombine.high %v421_v8, %v425_v13  ;;  %v430_v19 = vcombine.low %v419_v9, %v423_v14  ;;  %v431_v20 = vcombine.high %v419_v9, %v423_v14 }
  0x9f   : > { %v1568_v21 = vpack.i.bf16 %v2049_v12, %v2052_v4  ;;  %v1578_v41 = vpack.i.bf16 %v2063_v25, %v2057_v24  ;;  %v1588_v42 = vpack.i.bf16 %v2101_v38, %v2108_v62  ;;  %v2118_v8 = vrot.slane %v238_v43, %v2036_v1 }
  0xa0   : > { %v2066_v26 = vrot.slane %v446_v15, %v1940_v7  ;;  %v461_v27 = vrot.slane %v447_v18, %v1940_v7  ;;  %v2070_v30 = vrot.slane %v430_v19, %v1940_v7  ;;  %v445_v31 = vrot.slane %v431_v20, %v1940_v7 }
  0xa1   : > { %1569 = vrot.lane.b32.xlu1 %v1568_v21, %s1822_s21  ;;  %v764_v32 = vpop.permute.xlu1 %763  ;;  %v762_v35 = vpop.permute.xlu0 %761 }
  0xa2   : > { %v463_v36 = vcombine.high %v2070_v30, %v2066_v26  ;;  %v478_v37 = vcombine.low %v445_v31, %v461_v27  ;;  %v479_v60 = vcombine.high %v445_v31, %v461_v27 }
  0xa4   : > { %v2091_v56 = vrot.slane %v478_v37, %v2036_v1  ;;  %v2094_v57 = vrot.slane %v463_v36, %v2036_v1  ;;  %v2121_v9 = vrot.slane %v479_v60, %v2036_v1 }
  0xa5   : > { %1579 = vrot.lane.b32.xlu1 %v1578_v41, %s1823_s24  ;;  %v768_v58 = vpop.permute.xlu1 %767  ;;  %v766_v59 = vpop.permute.xlu0 %765 }
  0xa6   : > { %v1583_v39 = vpack.i.bf16 %v2091_v56, %v2082_v54  ;;  %v1573_v61 = vpack.i.bf16 %v2094_v57, %v2088_v55  ;;  %v789_v63 = vcombine.low %v764_v32, %v768_v58  ;;  %v790_v0 = vcombine.high %v764_v32, %v768_v58 }
  0xa7   : > { %v773_v5 = vcombine.low %v762_v35, %v766_v59  ;;  %v774_v6 = vcombine.high %v762_v35, %v766_v59  ;;  %v1598_v20 = vpack.i.bf16 %v2121_v9, %v2118_v8 }
  0xa8   : > { %1574 = vrot.lane.b32.xlu0 %v1573_v61, %s1822_s21  ;;  %v2124_v10 = vrot.slane %v789_v63, %v1940_v7  ;;  %v2127_v11 = vrot.slane %v790_v0, %v1940_v7 }
  0xa9   : > { %1584 = vrot.lane.b32.xlu1 %v1583_v39, %s1823_s24  ;;  %v992_v29 = vpop.permute.xlu1 %991  ;;  %v990_v34 = vpop.permute.xlu0 %989  ;;  %v2130_v13 = vrot.slane %v773_v5, %v1940_v7  ;;  %v2133_v14 = vrot.slane %v774_v6, %v1940_v7 }
  0xab   : > { %v806_v35 = vcombine.high %v2130_v13, %v2124_v10  ;;  %v821_v36 = vcombine.low %v2133_v14, %v2127_v11 }
  0xac   : > { %1589 = vrot.lane.b32.xlu0 %v1588_v42, %s1824_s27 }
  0xad   : > { %v996_v17 = vpop.permute.xlu1 %995  ;;  %v994_v23 = vpop.permute.xlu0 %993  ;;  %v2160_v63 = vrot.slane %v806_v35, %v2036_v1  ;;  %v2163_v0 = vrot.slane %v821_v36, %v2036_v1  ;;  %v347_v35 = vcombine.low %v2039_v2, %v2042_v3 }
  0xae   : > { %v1017_v43 = vcombine.low %v992_v29, %v996_v17  ;;  %v1018_v15 = vcombine.high %v992_v29, %v996_v17  ;;  %v1001_v18 = vcombine.low %v990_v34, %v994_v23  ;;  %v1002_v19 = vcombine.high %v990_v34, %v994_v23 }
  0xb0   : > { %v2139_v21 = vrot.slane %v1017_v43, %v1940_v7  ;;  %v1032_v27 = vrot.slane %v1018_v15, %v1940_v7  ;;  %v2143_v31 = vrot.slane %v1001_v18, %v1940_v7  ;;  %v1016_v32 = vrot.slane %v1002_v19, %v1940_v7  ;;  %1599 = vrot.lane.b32.xlu0 %v1598_v20, %s1824_s27 }
  0xb1   : > { %v649_v37 = vpop.permute.xlu1 %648  ;;  %v647_v40 = vpop.permute.xlu0 %646 }
  0xb2   : > { %v1034_v41 = vcombine.high %v2143_v31, %v2139_v21  ;;  %v1049_v58 = vcombine.low %v1016_v32, %v1032_v27 }
  0xb4   : > { %v2154_v59 = vrot.slane %v1034_v41, %v2036_v1  ;;  %v2157_v60 = vrot.slane %v1049_v58, %v2036_v1  ;;  %v2191_v58 = vrot.slane %v915_v50, %v2036_v1  ;;  %v2215_v50 = vrot.slane %v931_v52, %v2036_v1 }
  0xb5   : > { %v653_v39 = vpop.permute.xlu1 %652  ;;  %v651_v61 = vpop.permute.xlu0 %650 }
  0xb6   : > { %v674_v5 = vcombine.low %v649_v37, %v653_v39  ;;  %v675_v6 = vcombine.high %v649_v37, %v653_v39  ;;  %v658_v29 = vcombine.low %v647_v40, %v651_v61  ;;  %v659_v34 = vcombine.high %v647_v40, %v651_v61 }
  0xb7   : > { %v1593_v42 = vpack.i.bf16 %v2154_v59, %v2160_v63  ;;  %v1608_v17 = vpack.i.bf16 %v2157_v60, %v2163_v0  ;;  %v1050_v40 = vcombine.high %v1016_v32, %v1032_v27  ;;  %v2197_v39 = vrot.slane %v930_v51, %v2036_v1 }
  0xb8   : > { %v2170_v23 = vrot.slane %v674_v5, %v1940_v7  ;;  %v689_v43 = vrot.slane %v675_v6, %v1940_v7  ;;  %v2174_v15 = vrot.slane %v658_v29, %v1940_v7  ;;  %v673_v18 = vrot.slane %v659_v34, %v1940_v7 }
  0xb9   : > { %1594 = vrot.lane.b32.xlu1 %v1593_v42, %s1822_s21  ;;  %1609 = vrot.lane.b32.xlu0 %v1608_v17, %s1823_s24  ;;  %v2179_v19 = vpop.permute.xlu1 %1106  ;;  %v2181_v20 = vpop.permute.xlu0 %1104  ;;  %v822_v27 = vcombine.high %v2133_v14, %v2127_v11  ;;  %v2221_v51 = vrot.slane %v571_v44, %v2036_v1  ;;  %v2224_v5 = vrot.slane %v347_v35, %v2036_v1  ;;  %v1825_v29 = vmov 0.0  }
  0xba   : > { %v691_v36 = vcombine.high %v2174_v15, %v2170_v23  ;;  %v706_v37 = vcombine.low %v673_v18, %v689_v43  ;;  %v707_v41 = vcombine.high %v673_v18, %v689_v43  ;;  %v462_v11 = vcombine.low %v2070_v30, %v2066_v26  ;;  %1471 = vmatprep.mubr.msk.f32.mxu0 %vm1831_vm0, %v1825_v29 }
  0xbb   : > { %v2237_v33 = vrot.slane %v1050_v40, %v2036_v1  ;;  %v2251_v30 = vrot.slane %v822_v27, %v2036_v1  ;;  %v603_v34 = vcombine.high %v2221_v51, %v1825_v29  ;;  %v2261_v42 = vrot.slane %v221_v45, %v2036_v1 }
  0xbc   : > { %v2200_v2 = vrot.slane %v691_v36, %v2036_v1  ;;  %v2203_v3 = vrot.slane %v706_v37, %v2036_v1  ;;  %v2240_v44 = vrot.slane %v707_v41, %v2036_v1  ;;  %v2264_v17 = vrot.slane %v462_v11, %v2036_v1 }
  0xbd   : > { %v2207_v32 = vpop.permute.xlu1 %1110  ;;  %v2209_v61 = vpop.permute.xlu0 %1108  ;;  %v1618_v43 = vpack.i.bf16 %v2237_v33, %v2251_v30  ;;  %v379_v35 = vcombine.high %v2224_v5, %v1825_v29  ;;  %v604_v22 = vcombine.high %v2049_v12, %v1825_v29  ;;  %v253_v45 = vcombine.high %v2261_v42, %v1825_v29 }
  0xbe   : > { %v1132_v14 = vcombine.low %v2179_v19, %v2207_v32  ;;  %v1116_v47 = vcombine.low %v2181_v20, %v2209_v61  ;;  %v1603_v49 = vpack.i.bf16 %v2191_v58, %v2200_v2  ;;  %v1613_v28 = vpack.i.bf16 %v2197_v39, %v2203_v3 }
  0xbf   : > { %v1623_v18 = vpack.i.bf16 %v2215_v50, %v2240_v44  ;;  %v1033_v36 = vcombine.low %v2143_v31, %v2139_v21  ;;  %v1628_v37 = vpack.i.bf16 %v603_v34, %v379_v35  ;;  %v380_v40 = vcombine.high %v2052_v4, %v1825_v29 }
  0xc0   : > { %v2243_v52 = vrot.slane %v1132_v14, %v1940_v7  ;;  %v2246_v26 = vrot.slane %v1116_v47, %v1940_v7  ;;  %1604 = vrot.lane.b32.xlu1 %v1603_v49, %s1822_s21  ;;  %1614 = vrot.lane.b32.xlu0 %v1613_v28, %s1823_s24  ;;  %v494_v41 = vcombine.high %v2264_v17, %v1825_v29  ;;  %v1830_v35 = vmov 0.0|0.0  }
  0xc1   : > { %v805_v27 = vcombine.low %v2130_v13, %v2124_v10  ;;  %v381_v12 = vcombine.high %v2057_v24, %v1825_v29  ;;  %v605_v21 = vcombine.high %v2063_v25, %v1825_v29  ;;  %v254_v4 = vcombine.high %v2088_v55, %v1825_v29  ;;  %1474 = vmatprep.subr.bf16.mxu0 %v1830_v35 }
  0xc2   : > { %v1149_v6 = vcombine.high %v2246_v26, %v2243_v52  ;;  %v2299_v31 = vrot.slane %v1033_v36, %v2036_v1  ;;  %v1638_v11 = vpack.i.bf16 %v604_v22, %v380_v40  ;;  %v1633_v10 = vpack.i.bf16 %v494_v41, %v253_v45 }
  0xc3   : > { %v495_v13 = vcombine.high %v2094_v57, %v1825_v29  ;;  %v2304_v14 = vrot.slane %v805_v27, %v2036_v1  ;;  %v382_v24 = vcombine.high %v2108_v62, %v1825_v29  ;;  %v606_v25 = vcombine.high %v2101_v38, %v1825_v29 }
  0xc4   : > { %1619 = vrot.lane.b32.xlu1 %v1618_v43, %s1824_s27  ;;  %1624 = vrot.lane.b32.xlu0 %v1623_v18, %s1824_s27  ;;  %v2275_v16 = vrot.slane %v1149_v6, %v2036_v1  ;;  %v690_v55 = vcombine.low %v2174_v15, %v2170_v23  ;;  %v1648_v47 = vpack.i.bf16 %v605_v21, %v381_v12  ;;  %v1832_v21 = vmov 0  }
  0xc5   : > { %v1643_v49 = vpack.i.bf16 %v495_v13, %v254_v4  ;;  %v1065_v57 = vcombine.high %v2299_v31, %v1825_v29  ;;  %v837_v28 = vcombine.high %v2304_v14, %v1825_v29  ;;  %v1663_v62 = vpack.i.bf16 %v606_v25, %v382_v24  ;;  %1708 = vset.pattern.permute.xlu1 %v1832_v21 }
  0xc6   : > { %v255_v38 = vcombine.high %v2082_v54, %v1825_v29  ;;  %v2326_v23 = vrot.slane %v914_v53, %v2036_v1  ;;  %v2329_v15 = vrot.slane %v690_v55, %v2036_v1  ;;  %v1066_v34 = vcombine.high %v2154_v59, %v1825_v29 }
  0xc7   : > { %v1653_v6 = vpack.i.bf16 %v1065_v57, %v837_v28  ;;  %v496_v43 = vcombine.high %v2091_v56, %v1825_v29  ;;  %v838_v46 = vcombine.high %v2160_v63, %v1825_v29  ;;  %v256_v48 = vcombine.high %v2118_v8, %v1825_v29 }
  0xc8   : > { %1189 = vrot.lane.b32.xlu1 %v2275_v16, %s1822_s21  ;;  %1629 = vrot.lane.b32.xlu0 %v1628_v37, %s1826_s28  ;;  %v946_v53 = vcombine.high %v2326_v23, %v1825_v29  ;;  %v497_v59 = vcombine.high %v2121_v9, %v1825_v29  ;;  %v722_v56 = vcombine.high %v2329_v15, %v1825_v29  ;;  %v1833_v4 = vmov 1   ;;  %s177_s21 = scalar_lea.vmem [#allocation2], %s1435_s11 }
  0xc9   : > { %v1673_v54 = vpack.i.bf16 %v1066_v34, %v838_v46  ;;  %v1658_v18 = vpack.i.bf16 %v496_v43, %v255_v38  ;;  %v1067_v8 = vcombine.high %v2157_v60, %v1825_v29  ;;  %v723_v45 = vcombine.high %v2200_v2, %v1825_v29  ;;  %1709 = vset.pattern.permute.xlu0 %v1833_v4 }
  0xca   : > { %v1678_v63 = vpack.i.bf16 %v497_v59, %v256_v48  ;;  %v1668_v22 = vpack.i.bf16 %v946_v53, %v722_v56  ;;  %v947_v9 = vcombine.high %v2191_v58, %v1825_v29  ;;  %v839_v36 = vcombine.high %v2163_v0, %v1825_v29 }
  0xcb   : > { %v1133_v37 = vcombine.high %v2179_v19, %v2207_v32  ;;  %v1068_v60 = vcombine.high %v2237_v33, %v1825_v29  ;;  %v948_v2 = vcombine.high %v2197_v39, %v1825_v29  ;;  %v1117_v58 = vcombine.high %v2181_v20, %v2209_v61 }
  0xcc   : > { %1639 = vrot.lane.b32.xlu1 %v1638_v11, %s1827_s29  ;;  %1634 = vrot.lane.b32.xlu0 %v1633_v10, %s1826_s28  ;;  %v1688_v40 = vpack.i.bf16 %v1067_v8, %v839_v36  ;;  %v1148_v0 = vcombine.low %v2246_v26, %v2243_v52  ;;  %v1683_v41 = vpack.i.bf16 %v947_v9, %v723_v45 }
  0xcd   : > { %v724_v27 = vcombine.high %v2203_v3, %v1825_v29  ;;  %v840_v19 = vcombine.high %v2251_v30, %v1825_v29  ;;  %v1147_v32 = vrot.slane %v1133_v37, %v1940_v7  ;;  %v949_v20 = vcombine.high %v2215_v50, %v1825_v29 }
  0xce   : > { %v1131_v61 = vrot.slane %v1117_v58, %v1940_v7  ;;  %v725_v52 = vcombine.high %v2240_v44, %v1825_v29  ;;  %v2383_v3 = vrot.slane %v1148_v0, %v2036_v1  ;;  %v1181_v44 = vcombine.high %v2275_v16, %v1825_v29  ;;  %v1314_v16 = vld [vmem:[%s2592_s2] sm:$0xff] }
  0xcf   : > { %v1698_v39 = vpack.i.bf16 %v1068_v60, %v840_v19  ;;  %v1693_v33 = vpack.i.bf16 %v948_v2, %v724_v27 }
  0xd0   : > { %1649 = vrot.lane.b32.xlu1 %v1648_v47, %s1828_s4  ;;  %1644 = vrot.lane.b32.xlu0 %v1643_v49, %s1827_s29  ;;  %v1164_v26 = vcombine.low %v1131_v61, %v1147_v32  ;;  %v1703_v30 = vpack.i.bf16 %v949_v20, %v725_v52  ;;  %v1180_v12 = vcombine.high %v2383_v3, %v1825_v29 }
  0xd1   : > { %v1165_v7 = vcombine.high %v1131_v61, %v1147_v32 }
  0xd2   : > { %v1172_v50 = vrot.slane %v1164_v26, %v2036_v1 }
  0xd3   : > { %v1179_v11 = vrot.slane %v1165_v7, %v2036_v1 }
  0xd4   : > { %1664 = vrot.lane.b32.xlu1 %v1663_v62, %s1829_s5  ;;  %1654 = vrot.lane.b32.xlu0 %v1653_v6, %s1826_s28  ;;  %v1182_v10 = vcombine.high %v1172_v50, %v1825_v29 }
  0xd5   : > { %v1183_v13 = vcombine.high %v1179_v11, %v1825_v29 }
  0xd8   : > { %1674 = vrot.lane.b32.xlu1 %v1673_v54, %s1827_s29  ;;  %1659 = vrot.lane.b32.xlu0 %v1658_v18, %s1828_s4 }
  0xdc   : > { %1679 = vrot.lane.b32.xlu1 %v1678_v63, %s1829_s5  ;;  %1669 = vrot.lane.b32.xlu0 %v1668_v22, %s1826_s28 }
  0xe0   : > { %1689 = vrot.lane.b32.xlu1 %v1688_v40, %s1828_s4  ;;  %1684 = vrot.lane.b32.xlu0 %v1683_v41, %s1827_s29 }
  0xe4   : > { %1699 = vrot.lane.b32.xlu1 %v1698_v39, %s1829_s5  ;;  %1694 = vrot.lane.b32.xlu0 %v1693_v33, %s1828_s4 }
  0xe8   : > { %1704 = vrot.lane.b32.xlu1 %v1703_v30, %s1829_s5  ;;  %1185 = vrot.lane.b32.xlu0 %v1180_v12, %s1826_s28  ;;  %s1350_s28 = sshll.u32 %s177_s21, 4  ;;  %s2539_s28 = int_to_ptr.vmem [resolvable:$true] %s1350_s28 }
  0xe9   : > { %s1722_s6 = scalar_lea.vmem %s2539_s28, 128 }
  0xea   : > { %p1723_p13 = scmp.ne.s32.totalorder %s2539_s28, %s1722_s6 }
  0xec   : > { %1197 = vrot.lane.b32.xlu1 %v1172_v50, %s1823_s24  ;;  %1193 = vrot.lane.b32.xlu0 %v1181_v44, %s1827_s29  ;;  %s1346_s24 = sadd.s32 %s1800_s15, %s1451_s20  ;;  %p1724_p0 = pnand %p1723_p13, %p1906_p3 }
  0xed   : > { %s1834_s15 = smov [#allocation2]  }
  0xee   : > { %p1725_p1 = pneg %p1724_p0  ;;  %s1726_s7 = sshll.u32 %s1834_s15, 4  ;;  %s1727_s7 = int_to_ptr.vmem [resolvable:$false] %s1726_s7 }
  0xef   : > { %s1728_s8 = scalar_lea.vmem %s1727_s7, 256  ;;  %p1729_p2 = scmp.lt.s32.totalorder %s2539_s28, %s1727_s7 }
  0xf0   : > { %1205 = vrot.lane.b32.xlu1 %v1179_v11, %s1824_s27  ;;  %1201 = vrot.lane.b32.xlu0 %v1182_v10, %s1828_s4  ;;  %s1452_s27 = sshll.u32 %s1346_s24, 7  ;;  %p1730_p4 = scmp.lt.s32.totalorder %s1728_s8, %s1722_s6 }
  0xf2   : > { %p1731_p5 = por %p1730_p4, %p1729_p2 }
  0xf4   : > { %1209 = vrot.lane.b32.xlu0 %v1183_v13, %s1829_s5  ;;  %1317 = vperm.xlu1 %1708, %v1314_v16   ;;  %s2537_s5 = scalar_lea.hbm %s2593_s3, %s1452_s27  ;;  %p1732_p6 = pnand %p1731_p5, %p1725_p1 }
  0xf8   : > { %1322 = vperm.xlu0 %1709, %v1314_v16  }
 0x113   : > { %v1570_v24 = vpop.permute.xlu1 %1569 }
 0x114   : > { %v1571_v56 = vunpack.i.l.bf16 %v1570_v24  ;;  %v1572_v63 = vunpack.i.h.bf16 %v1570_v24 }
 0x117   : > { %v1580_v1 = vpop.permute.xlu1 %1579 }
 0x118   : > { %v1582_v36 = vunpack.i.h.bf16 %v1580_v1  ;;  %v1581_v37 = vunpack.i.l.bf16 %v1580_v1 }
 0x11a   : > { %v2406_v25 = vpop.permute.xlu0 %1574 }
 0x11b   : > { %v2410_v47 = vpop.permute.xlu1 %1584  ;;  %v1577_v58 = vunpack.i.h.bf16 %v2406_v25  ;;  %v1576_v19 = vunpack.i.l.bf16 %v2406_v25 }
 0x11c   : > { %v1587_v60 = vunpack.i.h.bf16 %v2410_v47  ;;  %v1586_v2 = vunpack.i.l.bf16 %v2410_v47 }
 0x11e   : > { %v2408_v55 = vpop.permute.xlu0 %1589 }
 0x11f   : > { %v1591_v20 = vunpack.i.l.bf16 %v2408_v55 }
 0x122   : > { %v2412_v49 = vpop.permute.xlu0 %1599 }
 0x123   : > { %v1602_v50 = vunpack.i.h.bf16 %v2412_v49  ;;  %v1601_v44 = vunpack.i.l.bf16 %v2412_v49 }
 0x12b   : > { %v2414_v57 = vpop.permute.xlu1 %1594  ;;  %v2416_v28 = vpop.permute.xlu0 %1609 }
 0x12c   : > { %v1597_v21 = vunpack.i.h.bf16 %v2414_v57 }
 0x132   : > { %v2418_v62 = vpop.permute.xlu1 %1604  ;;  %v2420_v38 = vpop.permute.xlu0 %1614 }
 0x136   : > { %v2422_v6 = vpop.permute.xlu1 %1619  ;;  %v2424_v34 = vpop.permute.xlu0 %1624 }
 0x13a   : > { %v2426_v43 = vpop.permute.xlu1 %1189  ;;  %v1630_v46 = vpop.permute.xlu0 %1629 }
 0x13b   : > { %v1631_v48 = vunpack.i.l.bf16 %v1630_v46  ;;  %v1632_v53 = vunpack.i.h.bf16 %v1630_v46 }
 0x13d   : > { %v411_v54 = vsel %vm285_vm1, %v2224_v5, %v1631_v48  ;;  %v635_v22 = vsel %vm285_vm1, %v2221_v51, %v1632_v53  ;;  %v1592_v51 = vunpack.i.h.bf16 %v2408_v55  ;;  %v1612_v53 = vunpack.i.h.bf16 %v2416_v28 }
 0x13e   : > { %v1640_v18 = vpop.permute.xlu1 %1639  ;;  %v1635_v59 = vpop.permute.xlu0 %1634  ;;  %v412_v40 = vsel %vm287_vm2, %v411_v54, %v1571_v56  ;;  %v636_v32 = vsel %vm287_vm2, %v635_v22, %v1572_v63  ;;  %v1611_v54 = vunpack.i.l.bf16 %v2416_v28 }
 0x13f   : > { %v1641_v8 = vunpack.i.l.bf16 %v1640_v18  ;;  %v1642_v45 = vunpack.i.h.bf16 %v1640_v18  ;;  %v1637_v9 = vunpack.i.h.bf16 %v1635_v59  ;;  %v1636_v5 = vunpack.i.l.bf16 %v1635_v59 }
 0x141   : > { %v413_v0 = vsel %vm289_vm3, %v412_v40, %v1641_v8  ;;  %v637_v61 = vsel %vm289_vm3, %v636_v32, %v1642_v45  ;;  %v526_v33 = vsel %vm285_vm1, %v2264_v17, %v1637_v9  ;;  %v286_v26 = vsel %vm285_vm1, %v2261_v42, %v1636_v5 }
 0x142   : > { %v1650_v41 = vpop.permute.xlu1 %1649  ;;  %v1645_v27 = vpop.permute.xlu0 %1644  ;;  %v414_v30 = vsel %vm291_vm4, %v413_v0, %v1581_v37  ;;  %v638_v17 = vsel %vm291_vm4, %v637_v61, %v1582_v36  ;;  %v1596_v42 = vunpack.i.l.bf16 %v2414_v57  ;;  %v288_v1 = vsel %vm287_vm2, %v286_v26, %v1576_v19 }
 0x143   : > { %v1651_v39 = vunpack.i.l.bf16 %v1650_v41  ;;  %v1652_v52 = vunpack.i.h.bf16 %v1650_v41  ;;  %v1647_v12 = vunpack.i.h.bf16 %v1645_v27  ;;  %v1646_v7 = vunpack.i.l.bf16 %v1645_v27 }
 0x144   : > { %v527_v55 = vsel %vm287_vm2, %v526_v33, %v1577_v58 }
 0x145   : > { %v415_v4 = vsel %vm293_vm5, %v414_v30, %v1651_v39  ;;  %v639_v25 = vsel %vm293_vm5, %v638_v17, %v1652_v52  ;;  %v290_v47 = vsel %vm289_vm3, %v288_v1, %v1646_v7  ;;  %v528_v49 = vsel %vm289_vm3, %v527_v55, %v1647_v12 }
 0x146   : > { %v1665_v11 = vpop.permute.xlu1 %1664  ;;  %v1655_v10 = vpop.permute.xlu0 %1654  ;;  %v416_v48 = vsel %vm295_vm6, %v415_v4, %v1591_v20  ;;  %v640_v9 = vsel %vm295_vm6, %v639_v25, %v1592_v51  ;;  %v292_v37 = vsel %vm291_vm4, %v290_v47, %v1586_v2  ;;  %v529_v28 = vsel %vm291_vm4, %v528_v49, %v1587_v60 }
 0x147   : > { %v1666_v16 = vunpack.i.l.bf16 %v1665_v11  ;;  %v1657_v13 = vunpack.i.h.bf16 %v1655_v10  ;;  %v1656_v24 = vunpack.i.l.bf16 %v1655_v10  ;;  %v1667_v46 = vunpack.i.h.bf16 %v1665_v11 }
 0x148   : > { %v1617_v49 = vunpack.i.h.bf16 %v2420_v38 }
 0x149   : > { %v417_v18 = vsel %vm297_vm7, %v416_v48, %v1666_v16  ;;  %v869_v57 = vsel %vm285_vm1, %v2304_v14, %v1656_v24  ;;  %v1097_v8 = vsel %vm285_vm1, %v2299_v31, %v1657_v13  ;;  %v641_v40 = vsel %vm297_vm7, %v640_v9, %v1667_v46 }
 0x14a   : > { %v1675_v59 = vpop.permute.xlu1 %1674  ;;  %v1660_v56 = vpop.permute.xlu0 %1659  ;;  %v870_v5 = vsel %vm287_vm2, %v869_v57, %v1596_v42  ;;  %v1607_v31 = vunpack.i.h.bf16 %v2418_v62  ;;  %v1220_v0 = vrot.slane %v417_v18, 4  ;;  %v1098_v27 = vsel %vm287_vm2, %v1097_v8, %v1597_v21 }
 0x14b   : > { %v1676_v63 = vunpack.i.l.bf16 %v1675_v59  ;;  %v1662_v22 = vunpack.i.h.bf16 %v1660_v56  ;;  %v1661_v45 = vunpack.i.l.bf16 %v1660_v56  ;;  %v1677_v36 = vunpack.i.h.bf16 %v1675_v59 }
 0x14c   : > { %v1223_v20 = vrot.slane %v641_v40, 4  ;;  %v1606_v21 = vunpack.i.l.bf16 %v2418_v62  ;;  %v1616_v46 = vunpack.i.l.bf16 %v2420_v38  ;;  %v1622_v48 = vunpack.i.h.bf16 %v2422_v6 }
 0x14d   : > { %v294_v14 = vsel %vm293_vm5, %v292_v37, %v1661_v45  ;;  %v530_v58 = vsel %vm293_vm5, %v529_v28, %v1662_v22  ;;  %v871_v41 = vsel %vm289_vm3, %v870_v5, %v1676_v63  ;;  %v1099_v61 = vsel %vm289_vm3, %v1098_v27, %v1677_v36 }
 0x14e   : > { %v1680_v19 = vpop.permute.xlu1 %1679  ;;  %v1670_v51 = vpop.permute.xlu0 %1669  ;;  %v296_v33 = vsel %vm295_vm6, %v294_v14, %v1601_v44  ;;  %v531_v52 = vsel %vm295_vm6, %v530_v58, %v1602_v50  ;;  %v872_v11 = vsel %vm291_vm4, %v871_v41, %v1611_v54  ;;  %v1627_v28 = vunpack.i.h.bf16 %v2424_v34 }
 0x14f   : > { %v1682_v2 = vunpack.i.h.bf16 %v1680_v19  ;;  %v1681_v32 = vunpack.i.l.bf16 %v1680_v19  ;;  %v1672_v60 = vunpack.i.h.bf16 %v1670_v51  ;;  %v1671_v39 = vunpack.i.l.bf16 %v1670_v51 }
 0x151   : > { %v978_v26 = vsel %vm285_vm1, %v2326_v23, %v1672_v60  ;;  %v754_v30 = vsel %vm285_vm1, %v2329_v15, %v1671_v39  ;;  %v298_v12 = vsel %vm297_vm7, %v296_v33, %v1681_v32  ;;  %v532_v7 = vsel %vm297_vm7, %v531_v52, %v1682_v2 }
 0x152   : > { %v1690_v4 = vpop.permute.xlu1 %1689  ;;  %v1685_v10 = vpop.permute.xlu0 %1684  ;;  %v1232_v44 = vsel %vm1231_vm8, %v298_v12, %v1220_v0  ;;  %v1233_v50 = vsel %vm1231_vm8, %v532_v7, %v1223_v20  ;;  %v1100_v15 = vsel %vm291_vm4, %v1099_v61, %v1612_v53  ;;  %v755_v24 = vsel %vm287_vm2, %v754_v30, %v1606_v21  ;;  %v1236_v7 = vld [vmem:[%s2591_s1] sm:$0xff] }
 0x153   : > { %v1692_v17 = vunpack.i.h.bf16 %v1690_v4  ;;  %v1691_v16 = vunpack.i.l.bf16 %v1690_v4  ;;  %v1687_v23 = vunpack.i.h.bf16 %v1685_v10  ;;  %v1686_v13 = vunpack.i.l.bf16 %v1685_v10 }
 0x154   : > { %v979_v42 = vsel %vm287_vm2, %v978_v26, %v1607_v31  ;;  %v1475_v25 = vpack.c.bf16 %v1233_v50, %v1232_v44  ;;  %v1621_v53 = vunpack.i.l.bf16 %v2422_v6 }
 0x155   : > { %v873_v62 = vsel %vm293_vm5, %v872_v11, %v1691_v16  ;;  %v1101_v1 = vsel %vm293_vm5, %v1100_v15, %v1692_v17  ;;  %v756_v55 = vsel %vm289_vm3, %v755_v24, %v1686_v13  ;;  %v980_v47 = vsel %vm289_vm3, %v979_v42, %v1687_v23 }
 0x156   : > { %1476 = vmatpush3.bf16.msra.mxu0 %v1475_v25  ;;  %v1700_v54 = vpop.permute.xlu1 %1699  ;;  %v1695_v18 = vpop.permute.xlu0 %1694  ;;  %v874_v63 = vsel %vm295_vm6, %v873_v62, %v1621_v53  ;;  %v1102_v22 = vsel %vm295_vm6, %v1101_v1, %v1622_v48  ;;  %v757_v45 = vsel %vm291_vm4, %v756_v55, %v1616_v46  ;;  %v981_v38 = vsel %vm291_vm4, %v980_v47, %v1617_v49 }
 0x157   : > { %v1702_v57 = vunpack.i.h.bf16 %v1700_v54  ;;  %v1701_v59 = vunpack.i.l.bf16 %v1700_v54  ;;  %v1697_v56 = vunpack.i.h.bf16 %v1695_v18  ;;  %v1696_v8 = vunpack.i.l.bf16 %v1695_v18  ;;  %1477 = vmatprep.subr.bf16.mxu0 %v1830_v35 }
 0x158   : > { %v1626_v35 = vunpack.i.l.bf16 %v2424_v34 }
 0x159   : > { %v875_v9 = vsel %vm297_vm7, %v874_v63, %v1701_v59  ;;  %v1103_v6 = vsel %vm297_vm7, %v1102_v22, %v1702_v57  ;;  %v758_v36 = vsel %vm293_vm5, %v757_v45, %v1696_v8  ;;  %v982_v37 = vsel %vm293_vm5, %v981_v38, %v1697_v56 }
 0x15a   : > { %v1705_v40 = vpop.permute.xlu1 %1704  ;;  %v1186_v5 = vpop.permute.xlu0 %1185  ;;  %v1226_v0 = vrot.slane %v875_v9, 4  ;;  %v1229_v41 = vrot.slane %v1103_v6, 4  ;;  %v759_v27 = vsel %vm295_vm6, %v758_v36, %v1626_v35  ;;  %v983_v19 = vsel %vm295_vm6, %v982_v37, %v1627_v28 }
 0x15b   : > { %v1707_v14 = vunpack.i.h.bf16 %v1705_v40  ;;  %v1706_v58 = vunpack.i.l.bf16 %v1705_v40  ;;  %v1212_v31 = vsel %vm285_vm1, %v2383_v3, %v1186_v5 }
 0x15c   : > { %v1213_v34 = vsel %vm287_vm2, %v1212_v31, %v2426_v43 }
 0x15d   : > { %v760_v51 = vsel %vm297_vm7, %v759_v27, %v1706_v58  ;;  %v984_v2 = vsel %vm297_vm7, %v983_v19, %v1707_v14 }
 0x15e   : > { %v1198_v32 = vpop.permute.xlu1 %1197  ;;  %v1194_v60 = vpop.permute.xlu0 %1193  ;;  %v1234_v39 = vsel %vm1231_vm8, %v760_v51, %v1226_v0  ;;  %v1235_v20 = vsel %vm1231_vm8, %v984_v2, %v1229_v41 }
 0x15f   : > { %v1214_v3 = vsel %vm289_vm3, %v1213_v34, %v1194_v60  ;;  %v1478_v61 = vpack.c.bf16 %v1235_v20, %v1234_v39 }
 0x160   : > { %v1215_v33 = vsel %vm291_vm4, %v1214_v3, %v1198_v32 }
 0x161   : > { %1479 = vmatpush3.bf16.msra.mxu0 %v1478_v61 }
 0x162   : > { %v1202_v52 = vpop.permute.xlu0 %1201  ;;  %1469 = vmatprep.subr.mxu0 %v1825_v29  ;;  %v1206_v26 = vpop.permute.xlu1 %1205 }
 0x163   : > { %v1216_v30 = vsel %vm293_vm5, %v1215_v33, %v1202_v52 }
 0x164   : > { %v1217_v43 = vsel %vm295_vm6, %v1216_v30, %v1206_v26 }
 0x166   : > { %v1210_v12 = vpop.permute.xlu0 %1209 }
 0x167   : > { %v1218_v21 = vsel %vm297_vm7, %v1217_v43, %v1210_v12 }
 0x168   : > { %1470 = vmatpush3.msk.msra.mxu0 %vm1231_vm8, %v1218_v21 }
 0x169   : > { %1472 = vmatmul.mubr.msk.f32.vlgmr.msra.gmra.mrb[0].mxu0 %vm1237_vm9, %v1236_v7 }
 0x173   : > { %v1318_v4 = vpop.permute.xlu1 %1317 }
 0x177   : > { %v1323_v11 = vpop.permute.xlu0 %1322 }
 0x23c   : > { %v1310_v29 = vpop.f32.mrb[0].mxu0 }
 0x23d   : > { %v1320_v10 = vmul.f32 %v1318_v4, %v1310_v29  ;;  %v1473_v44 = vpop.f32.mrb[1].mxu0 }
 0x23f   : > { %v1325_v50 = vadd.f32 %v1323_v11, %v1320_v10 }
 0x241   : > { %v1326_v17 = vmax.f32 %v1325_v50, 0.0  ;;  %v1328_v16 = vmul.f32 0.15915494, %v1325_v50 }
 0x243   : > { %v1329_v23 = vadd.f32 0.5, %v1328_v16  ;;  %1327 = vst [vmem:[%s177_s21] sm:$0xf] %v1326_v17 }
 0x245   : > { %v1330_v13 = vfloor.f32 %v1329_v23 }
 0x247   : > { %v1331_v15 = vmul.f32 6.2831855, %v1330_v13 }
 0x249   : > { %v1332_v24 = vsub.f32 %v1325_v50, %v1331_v15 }
 0x24b   : > { %1333 = vst [vmem:[%s177_s21] sm:$0xf0] %v1332_v24 }
 0x24c   : > { %1735 = shalt.err (!%p1732_p6)
}
 0x24d   : > { %s1736_s9 = scalar_lea.hbm %s2537_s5, 128  ;;  %s1740_s20 = scalar_lea.hbm %s2593_s3, 512 }
 0x24e   : > { %p1737_p7 = scmp.ne.s32.totalorder %s2537_s5, %s1736_s9  ;;  %p1741_p11 = scmp.lt.u32.totalorder %s2537_s5, %s2593_s3 }
 0x24f   : > { %p1742_p12 = scmp.lt.u32.totalorder %s1740_s20, %s1736_s9  ;;  %p1744_p0 = scmp.lt.u32.totalorder %s1736_s9, %s2537_s5 }
 0x250   : > { %p1738_p9 = pnand %p1737_p7, %p1906_p3 }
 0x251   : > { %p1743_p13 = por %p1742_p12, %p1741_p11 }
 0x252   : > { %p1739_p10 = pneg %p1738_p9 }
 0x253   : > { %p1745_p1 = por %p1744_p0, %p1743_p13 }
 0x255   : > { %p1746_p2 = pnand %p1745_p1, %p1739_p10 }
 0x257   : > { %1749 = shalt.err (!%p1746_p2)
}
 0x258   : > { %1481 = dma.vmem_to_hbm [thread:$0]  (%p1906_p3), %s2539_s28, 128, %s2537_s5, %s1335_s16  }
 0x259 PF: > { %p1487_p4 = scmp.ge.s32.totalorder %s1816_s19, 2  ;;  %s1362_s27 = sand.u32 1, %s1788_s12  }
 0x25a   : > { %s1363_s29 = scalar_lea.sflag [#allocation3], %s1362_s27 }
 0x25b   : > { %p1484_p5 = pnand %p1487_p4, %p1915_p8 }
 0x25d   : > { %1783 = dma.done.wait (!%p1484_p5), %s1363_s29, 128  }
 0x25e   : > { %1785 = vsyncadd (!%p1484_p5), %s1363_s29, 4294967168  ;;  %s16_s19 = sadd.s32 1, %s1816_s19   ;;  %s2596_s12 = smov %s1792_s13 }
 0x25f   : > { %p13_p6 = scmp.ge.s32.totalorder %s16_s19, 6   ;;  %s2597_s13 = smov %s1796_s14 }
 0x260   : > { %s2598_s14 = smov %s1924_s30  ;;  %s2599_s15 = smov %s1808_s17 }
 0x261   : > { %s2600_s16 = smov %s1812_s18  ;;  %s2601_s17 = smov %s2604_s22 }
 0x262   : > { %s2602_s18 = smov %s2608_s23  ;;  %15 = sbr.rel (!%p13_p6) target bundleno = 5 (0x5), region = 70 }
 0x269   :  { %1368 = vsyncpa [#allocation3], 1 }
 0x26a   :  { %1370 = vsyncpa [#allocation3 + $0x1], 1 }

</bundles_post_ra>
